<compile_context>
chip_gen: v5e
topology: v5e:2x2
jax: 0.10.0
libtpu: 0.0.40
codegen_flags: <defaults>
</compile_context>

<pallas_src>
import functools

import jax
import jax.numpy as jnp
from jax.experimental import pallas as pl
from jax.experimental.pallas import tpu as pltpu

LABEL_SMOOTHING = 0.1


def _mixup_loss_kernel(lam_ref, x_ref, ta_ref, tb_ref, out_ref, *, n_total):
    # lam_ref: (1,)  f32 in SMEM (replicated across grid steps)
    # x_ref:   (TM, C) logits tile in VMEM, native dtype (bf16 or f32)
    # ta_ref / tb_ref: (TM, 1) int32 target tiles in VMEM
    # out_ref: (1, 8, 128) f32 per-tile partial-loss block (value replicated)
    tile = pl.program_id(0)
    x = x_ref[...]                       # stay in native dtype; upcast per use
    tm, c = x.shape
    lam = lam_ref[0]
    eps = LABEL_SMOOTHING

    # --- softmax statistics: full logsumexp in one streaming sweep ----------
    # Row max is exact in the native dtype; exp argument is computed in f32.
    m = jnp.max(x, axis=-1, keepdims=True).astype(jnp.float32)           # (TM,1)
    sum_exp = jnp.sum(jnp.exp(x.astype(jnp.float32) - m),
                      axis=-1, keepdims=True)                            # (TM,1)
    lse = m + jnp.log(sum_exp)                                           # (TM,1)

    # --- fused mixup + label-smoothing target term ---------------------------
    # Uses sum_c(w) == 1:  L_i = logsumexp(x_i) - sum_c w_ic * x_ic  with
    #   w = eps/C + (1-eps) * (lam * onehot(a) + (1-lam) * onehot(b)).
    # One-hot picks are exact in the native dtype (single nonzero term per
    # row); only the smoothing sum uses an f32 accumulator.
    cls = jax.lax.broadcasted_iota(jnp.int32, (1, c), 1)                 # (1,C)
    zero = jnp.zeros((), x.dtype)
    pick_a = jnp.sum(jnp.where(cls == ta_ref[...], x, zero),
                     axis=-1, keepdims=True).astype(jnp.float32)         # (TM,1)
    pick_b = jnp.sum(jnp.where(cls == tb_ref[...], x, zero),
                     axis=-1, keepdims=True).astype(jnp.float32)         # (TM,1)
    sum_x = jnp.sum(x.astype(jnp.float32), axis=-1, keepdims=True)       # (TM,1)

    weighted = (jnp.float32(eps / c) * sum_x
                + jnp.float32(1.0 - eps) * (lam * pick_a + (1.0 - lam) * pick_b))
    per_sample = lse - weighted                                          # (TM,1)

    # Mask rows past the true batch size (last tile may read block padding).
    row = tile * tm + jax.lax.broadcasted_iota(jnp.int32, (tm, 1), 0)
    per_sample = jnp.where(row < n_total, per_sample, 0.0)

    partial = jnp.sum(per_sample) * jnp.float32(1.0 / n_total)           # mean / true N
    out_ref[...] = jnp.broadcast_to(partial, out_ref.shape).astype(out_ref.dtype)


def _choose_tile_rows(n, c, itemsize):
    # ~4 MiB of logits per block: big enough to amortize the ~0.35 us per-step
    # overhead on every generation, small enough that double-buffered input +
    # f32 temporaries fit comfortably inside v7x's 64 MiB physical VMEM
    # (v5e/v6e have 128 MiB and plenty of headroom).
    target_bytes = 4 * 1024 * 1024
    tm = target_bytes // max(1, c * itemsize)
    tm = max(8, min(2048, (tm // 8) * 8))
    if n > 8:
        # Guarantee >= 2 grid steps so dimension_semantics=("parallel",) can
        # shard the batch axis across both TensorCores on v7x (harmless on
        # single-TC v5e/v6e).
        half = max(8, (((n + 1) // 2) // 8) * 8)
        tm = min(tm, half)
    if n <= tm:
        return n                       # single block spanning the full batch
    return tm


def mixup_loss(logits, targets_a, targets_b, lam, *, tile_rows=None):
    """lam * CE_ls(logits, targets_a) + (1 - lam) * CE_ls(logits, targets_b)."""
    n, c = logits.shape
    itemsize = jnp.dtype(logits.dtype).itemsize
    if tile_rows is None:
        tile_rows = _choose_tile_rows(n, c, itemsize)
    tile_rows = min(tile_rows, n)
    if tile_rows < n:
        tile_rows = max(8, (tile_rows // 8) * 8)   # keep (8,128) sublane rule
    num_tiles = (n + tile_rows - 1) // tile_rows

    ta = targets_a.astype(jnp.int32).reshape(n, 1)
    tb = targets_b.astype(jnp.int32).reshape(n, 1)
    lam_arr = jnp.asarray(lam, jnp.float32).reshape(1)

    kernel = functools.partial(_mixup_loss_kernel, n_total=n)

    partials = pl.pallas_call(
        kernel,
        out_shape=jax.ShapeDtypeStruct((num_tiles, 8, 128), jnp.float32),
        grid=(num_tiles,),
        in_specs=[
            pl.BlockSpec(memory_space=pltpu.MemorySpace.SMEM),   # lam scalar
            pl.BlockSpec((tile_rows, c), lambda i: (i, 0)),      # logits tile
            pl.BlockSpec((tile_rows, 1), lambda i: (i, 0)),      # targets_a
            pl.BlockSpec((tile_rows, 1), lambda i: (i, 0)),      # targets_b
        ],
        out_specs=pl.BlockSpec((1, 8, 128), lambda i: (i, 0, 0)),  # aligned tile
        compiler_params=pltpu.CompilerParams(
            dimension_semantics=("parallel",),      # independent tiles (megacore)
            vmem_limit_bytes=48 * 1024 * 1024,
        ),
        cost_estimate=pl.CostEstimate(
            flops=6 * n * c,
            transcendentals=n * c + n,
            bytes_accessed=n * c * itemsize + 2 * n * 4 + num_tiles * 8 * 128 * 4,
        ),
    )(lam_arr, logits, ta, tb)

    # Tiny final reduction over per-tile partials (each already / true N).
    return jnp.sum(partials[:, 0, 0])


def _reference_mixup_loss(logits, targets_a, targets_b, lam):
    # pure-JAX reference matching torch.nn.CrossEntropyLoss(label_smoothing=0.1)
    logp = jax.nn.log_softmax(logits.astype(jnp.float32), axis=-1)
    n, c = logits.shape
    eps = LABEL_SMOOTHING

    def ce(t):
        picked = jnp.take_along_axis(logp, t.reshape(n, 1), axis=-1)[:, 0]
        smooth = jnp.mean(logp, axis=-1)
        return jnp.mean(-(1.0 - eps) * picked - eps * smooth)

    return lam * ce(targets_a) + (1.0 - lam) * ce(targets_b)


if __name__ == "__main__":
    key = jax.random.PRNGKey(0)
    k1, k2, k3 = jax.random.split(key, 3)

    N, C = 20, 32  # batch, num_classes (N deliberately not a multiple of tile)
    logits = jax.random.normal(k1, (N, C), dtype=jnp.float32)
    targets_a = jax.random.randint(k2, (N,), 0, C, dtype=jnp.int32)
    targets_b = jax.random.randint(k3, (N,), 0, C, dtype=jnp.int32)
    lam = 0.3

    ref = _reference_mixup_loss(logits, targets_a, targets_b, lam)

    # 1) Explicit-tile path: 3 tiles of 8 rows, partial last tile masked.
    out_tiled = jax.block_until_ready(
        mixup_loss(logits, targets_a, targets_b, lam, tile_rows=8))
    assert jnp.allclose(out_tiled, ref, atol=1e-5, rtol=1e-5), (out_tiled, ref)

    # 2) Auto-tile path (>= 2 grid steps) with native bf16 logits, upcast in-kernel.
    logits_bf16 = logits.astype(jnp.bfloat16)
    ref_bf16 = _reference_mixup_loss(
        logits_bf16.astype(jnp.float32), targets_a, targets_b, lam)
    out_bf16 = jax.block_until_ready(
        mixup_loss(logits_bf16, targets_a, targets_b, lam))
    assert jnp.allclose(out_bf16, ref_bf16, atol=1e-5, rtol=1e-5), (out_bf16, ref_bf16)

    print("KERNEL_OK")
</pallas_src>

<mosaic_0001>
module attributes {stable_mosaic.version = 11 : i64} {
  func.func @_mixup_loss_kernel(%arg0: i32, %arg1: memref<1xf32, #tpu.memory_space<smem>>, %arg2: memref<8x32xf32, #tpu.memory_space<vmem>>, %arg3: memref<8x1xi32, #tpu.memory_space<vmem>>, %arg4: memref<8x1xi32, #tpu.memory_space<vmem>>, %arg5: memref<1x8x128xf32, #tpu.memory_space<vmem>>) attributes {dimension_semantics = [#tpu.dimension_semantics<parallel>], iteration_bounds = array<i64: 3>, scalar_prefetch = 0 : i64, scratch_operands = 0 : i64, tpu.core_type = #tpu.core_type<tc>, window_params = [{transform_indices = @transform_0, window_bounds = array<i64: 1>}, {transform_indices = @transform_1, window_bounds = array<i64: 8, 32>}, {transform_indices = @transform_2, window_bounds = array<i64: 8, 1>}, {transform_indices = @transform_3, window_bounds = array<i64: 8, 1>}, {transform_indices = @transform_4, window_bounds = array<i64: 1, 8, 128>}]} {
    %c0 = arith.constant 0 : index
    %c0_0 = arith.constant 0 : index
    %0 = vector.load %arg2[%c0, %c0_0] : memref<8x32xf32, #tpu.memory_space<vmem>>, vector<8x32xf32>
    %c0_1 = arith.constant 0 : index
    %1 = memref.load %arg1[%c0_1] : memref<1xf32, #tpu.memory_space<smem>>
    %cst = arith.constant dense<0xFF800000> : vector<8xf32>
    %2 = vector.multi_reduction <maximumf>, %0, %cst [1] : vector<8x32xf32> to vector<8xf32>
    %3 = vector.shape_cast %2 : vector<8xf32> to vector<8x1xf32>
    %4 = vector.broadcast %3 : vector<8x1xf32> to vector<8x32xf32>
    %5 = arith.subf %0, %4 : vector<8x32xf32>
    %6 = math.exp %5 : vector<8x32xf32>
    %cst_2 = arith.constant dense<0.000000e+00> : vector<8xf32>
    %7 = vector.multi_reduction <add>, %6, %cst_2 [1] : vector<8x32xf32> to vector<8xf32>
    %8 = vector.shape_cast %7 : vector<8xf32> to vector<8x1xf32>
    %9 = math.log %8 : vector<8x1xf32>
    %10 = arith.addf %3, %9 : vector<8x1xf32>
    %11 = tpu.iota {dimensions = array<i32: 1>} : vector<1x32xi32>
    %c0_3 = arith.constant 0 : index
    %c0_4 = arith.constant 0 : index
    %12 = vector.load %arg3[%c0_3, %c0_4] : memref<8x1xi32, #tpu.memory_space<vmem>>, vector<8x1xi32>
    %13 = vector.broadcast %11 : vector<1x32xi32> to vector<8x32xi32>
    %14 = vector.broadcast %12 : vector<8x1xi32> to vector<8x32xi32>
    %15 = arith.cmpi eq, %13, %14 : vector<8x32xi32>
    %cst_5 = arith.constant 0.000000e+00 : f32
    %16 = vector.broadcast %cst_5 : f32 to vector<8x32xf32>
    %17 = arith.select %15, %0, %16 : vector<8x32xi1>, vector<8x32xf32>
    %cst_6 = arith.constant dense<0.000000e+00> : vector<8xf32>
    %18 = vector.multi_reduction <add>, %17, %cst_6 [1] : vector<8x32xf32> to vector<8xf32>
    %19 = vector.shape_cast %18 : vector<8xf32> to vector<8x1xf32>
    %c0_7 = arith.constant 0 : index
    %c0_8 = arith.constant 0 : index
    %20 = vector.load %arg4[%c0_7, %c0_8] : memref<8x1xi32, #tpu.memory_space<vmem>>, vector<8x1xi32>
    %21 = vector.broadcast %11 : vector<1x32xi32> to vector<8x32xi32>
    %22 = vector.broadcast %20 : vector<8x1xi32> to vector<8x32xi32>
    %23 = arith.cmpi eq, %21, %22 : vector<8x32xi32>
    %cst_9 = arith.constant 0.000000e+00 : f32
    %24 = vector.broadcast %cst_9 : f32 to vector<8x32xf32>
    %25 = arith.select %23, %0, %24 : vector<8x32xi1>, vector<8x32xf32>
    %cst_10 = arith.constant dense<0.000000e+00> : vector<8xf32>
    %26 = vector.multi_reduction <add>, %25, %cst_10 [1] : vector<8x32xf32> to vector<8xf32>
    %27 = vector.shape_cast %26 : vector<8xf32> to vector<8x1xf32>
    %cst_11 = arith.constant dense<0.000000e+00> : vector<8xf32>
    %28 = vector.multi_reduction <add>, %0, %cst_11 [1] : vector<8x32xf32> to vector<8xf32>
    %29 = vector.shape_cast %28 : vector<8xf32> to vector<8x1xf32>
    %cst_12 = arith.constant 3.125000e-03 : f32
    %30 = vector.broadcast %cst_12 : f32 to vector<8x1xf32>
    %31 = arith.mulf %30, %29 : vector<8x1xf32>
    %32 = vector.broadcast %1 : f32 to vector<8x1xf32>
    %33 = arith.mulf %32, %19 : vector<8x1xf32>
    %cst_13 = arith.constant 1.000000e+00 : f32
    %34 = arith.subf %cst_13, %1 : f32
    %35 = vector.broadcast %34 : f32 to vector<8x1xf32>
    %36 = arith.mulf %35, %27 : vector<8x1xf32>
    %37 = arith.addf %33, %36 : vector<8x1xf32>
    %cst_14 = arith.constant 0.899999976 : f32
    %38 = vector.broadcast %cst_14 : f32 to vector<8x1xf32>
    %39 = arith.mulf %38, %37 : vector<8x1xf32>
    %40 = arith.addf %31, %39 : vector<8x1xf32>
    %41 = arith.subf %10, %40 : vector<8x1xf32>
    %c8_i32 = arith.constant 8 : i32
    %42 = arith.muli %arg0, %c8_i32 : i32
    %43 = tpu.iota {dimensions = array<i32: 0>} : vector<8x1xi32>
    %44 = vector.broadcast %42 : i32 to vector<8x1xi32>
    %45 = arith.addi %44, %43 : vector<8x1xi32>
    %c20_i32 = arith.constant 20 : i32
    %46 = vector.broadcast %c20_i32 : i32 to vector<8x1xi32>
    %47 = arith.cmpi slt, %45, %46 : vector<8x1xi32>
    %cst_15 = arith.constant 0.000000e+00 : f32
    %48 = vector.broadcast %cst_15 : f32 to vector<8x1xf32>
    %49 = arith.select %47, %41, %48 : vector<8x1xi1>, vector<8x1xf32>
    %50 = vector.shape_cast %49 : vector<8x1xf32> to vector<1x8x1xf32>
    %cst_16 = arith.constant dense<0.000000e+00> : vector<1xf32>
    %51 = vector.multi_reduction <add>, %50, %cst_16 [1, 2] : vector<1x8x1xf32> to vector<1xf32>
    %52 = vector.shape_cast %51 : vector<1xf32> to vector<1x1x1xf32>
    %53 = vector.extract %52[0, 0, 0] : f32 from vector<1x1x1xf32>
    %cst_17 = arith.constant 5.000000e-02 : f32
    %54 = arith.mulf %53, %cst_17 : f32
    %55 = vector.broadcast %54 : f32 to vector<1x8x128xf32>
    %c0_18 = arith.constant 0 : index
    %c0_19 = arith.constant 0 : index
    %c0_20 = arith.constant 0 : index
    %56 = vector.load %arg5[%c0_18, %c0_19, %c0_20] : memref<1x8x128xf32, #tpu.memory_space<vmem>>, vector<1x8x128xf32>
    tpu.vector_store %arg5[%c0_18, %c0_19, %c0_20], %55 {strides = array<i32>} : memref<1x8x128xf32, #tpu.memory_space<vmem>>, vector<1x8x128xf32>,
    return
  }
  func.func @transform_0(%arg0: i32) -> i32 {
    %c0_i32 = arith.constant 0 : i32
    %c0_i32_0 = arith.constant 0 : i32
    return %c0_i32 : i32
  }
  func.func @transform_1(%arg0: i32) -> (i32, i32) {
    %c0_i32 = arith.constant 0 : i32
    %c0_i32_0 = arith.constant 0 : i32
    return %arg0, %c0_i32 : i32, i32
  }
  func.func @transform_2(%arg0: i32) -> (i32, i32) {
    %c0_i32 = arith.constant 0 : i32
    %c0_i32_0 = arith.constant 0 : i32
    return %arg0, %c0_i32 : i32, i32
  }
  func.func @transform_3(%arg0: i32) -> (i32, i32) {
    %c0_i32 = arith.constant 0 : i32
    %c0_i32_0 = arith.constant 0 : i32
    return %arg0, %c0_i32 : i32, i32
  }
  func.func @transform_4(%arg0: i32) -> (i32, i32, i32) {
    %c0_i32 = arith.constant 0 : i32
    %c0_i32_0 = arith.constant 0 : i32
    %c0_i32_1 = arith.constant 0 : i32
    return %arg0, %c0_i32, %c0_i32_0 : i32, i32, i32
  }
}

</mosaic_0001>

<bundles_post_ra>
// kernel: tpu_custom_call.1
= control target key start
LH: loop header
LB: loop body
LE: loop exit
PB: predicated region body
PF: predicated region fallthrough
CT: control target
= control target key end

     0   :  { %s650_s0 = inlined_call_operand.<no memory space> [shape: f32[1], index: 0, kind: input, shape index: {}]   ;;  %s651_s1 = inlined_call_operand.vmem [shape: f32[20,32], index: 1, kind: input, shape index: {}]   ;;  %s652_s2 = inlined_call_operand.vmem [shape: s32[20,1], index: 2, kind: input, shape index: {}]   ;;  %s653_s3 = inlined_call_operand.vmem [shape: s32[20,1], index: 3, kind: input, shape index: {}]   ;;  %s654_s4 = inlined_call_operand.hbm [shape: f32[3,8,128], index: 4, kind: output, shape index: {}]  }
   0x1   :  { %9 = sst [smem:[#allocation2]] %s650_s0 }
   0x2   :  { %10 = vsyncpa [#allocation4], 0 }
   0x3   :  { %12 = vsyncpa [#allocation4 + $0x1], 0  ;;  %s550_s17 = smov 0   ;;  %s552_s18 = smov 0  }
   0x4   :  { %s554_s19 = smov 0   ;;  %s556_s20 = smov 0  }
   0x5 LB: > { %s571_s0 = sadd.s32 4294967295, %s519_s20   ;;  %s396_s21 = sadd.s32 4294967294, %s519_s20   ;;  %s519_s20 = sphi %s556_s20, %s660_s20   ;;  %s515_s19 = sphi %s554_s19, %s659_s19   ;;  %s511_s18 = sphi %s552_s18, %s658_s18   ;;  %s507_s17 = sphi %s550_s17, %s657_s17  }
   0x6   : > { %s575_s22 = sadd.s32 1, %s519_s20   ;;  %s124_s23 = sadd.s32 1, %s515_s19 }
   0x7   : > { %s121_s24 = ssub.s32 %s519_s20, %s575_s22  ;;  %p134_p0 = scmp.ne.s32.totalorder %s515_s19, %s511_s18 }
   0x8   : > { %p122_p1 = scmp.eq.s32.totalorder %s121_s24, 0  ;;  %p135_p2 = scmp.eq.s32.totalorder %s571_s0, 2 }
   0x9   : > { %p140_p3 = scmp.ne.s32.totalorder %s511_s18, %s507_s17  ;;  %p141_p4 = scmp.eq.s32.totalorder %s396_s21, 2 }
   0xa   : > { %s586_s25 = scalar_select %p122_p1, %s515_s19, %s124_s23  }
   0xb   : > { %p588_p5 = por %p135_p2, %p134_p0  ;;  %p592_p6 = por %p141_p4, %p140_p3 }
   0xc   : > { %p399_p7 = scmp.ge.s32.totalorder %s519_s20, 1  ;;  %p183_p8 = scmp.lt.s32.totalorder %s519_s20, 4 }
   0xe   : > { %p184_p9 = pnand %p399_p7, %p183_p8 }
   0xf   : > { %p216_p10 = scmp.lt.s32.totalorder (!%p184_p9), %s571_s0, 2  ;;  %s229_s13 = sld [smem:[#allocation2]] (!%p184_p9) }
  0x10   : > { %187 = sbr.rel (%p184_p9) target bundleno = 489 (0x1e9), region = 36  ;;  %s404_s15 = sshll.u32 (!%p184_p9), %s571_s0, 3 }
  0x11   : > { %s213_s16 = sand.u32 (!%p184_p9), 1, %s511_s18  }
  0x12   : > { %s400_s21 = sshll.u32 (!%p184_p9), %s213_s16, 3  ;;  %s298_s8 = scalar_lea.sflag (!%p184_p9), [#allocation4], %s213_s16 }
  0x15   : > { %v521_v0 = vmov 0   ;;  %s217_s28 = scalar_select %p216_p10, %s571_s0, 2  ;;  %vm230_vm0 = vcmask 261120   ;;  %v243_v10 = vlaneseq  ;;  %v267_v22 = vstv %s229_s13 }
  0x16   : > { %451 = vset.pattern.permute.xlu0 %v521_v0  ;;  %452 = vset.pattern.permute.xlu1 %v521_v0  ;;  %s269_s14 = ssub.f32 1.0, %s229_s13  ;;  %v279_v29 = vstv %s404_s15  ;;  %vm283_vm4 = vcmask 7168  }
  0x17   : > { %s401_s29 = sshll.u32 %s217_s28, 3  ;;  %v244_v11 = vand.u32 127, %v243_v10  ;;  %v278_v27 = vshrl.u32 %v243_v10, 7  ;;  %s308_s28 = scalar_lea.hbm %s654_s4, %s404_s15 }
  0x18   : > { %s219_s6 = scalar_lea.vmem %s651_s1, %s401_s29  ;;  %s227_s9 = scalar_lea.vmem %s653_s3, %s401_s29  ;;  %v270_v21 = vstv %s269_s14 }
  0x19   : > { %v228_v1 = vld [vmem:[%s219_s6] sm:$0xff]  ;;  %s223_s12 = scalar_lea.vmem %s652_s2, %s401_s29  ;;  %v280_v32 = vadd.s32 %v279_v29, %v278_v27  ;;  %s215_s29 = scalar_lea.vmem [#allocation3], %s400_s21 }
  0x1a   : > { %v231_v2 = vsel %vm230_vm0, %v228_v1, -inf  ;;  %v254_v3 = vld [vmem:[%s227_s9] sm:$0xff]  ;;  %v263_v18 = vsel %vm230_vm0, %v228_v1, 0.0  ;;  %s310_s30 = sshll.u32 %s215_s29, 4  ;;  %s312_s5 = sshll.u32 %s308_s28, 4  ;;  %s311_s30 = int_to_ptr.vmem [resolvable:$true] %s310_s30  ;;  %s313_s5 = int_to_ptr.hbm [resolvable:$true] %s312_s5 }
  0x1b   : > { %232 = vmax.xlane.f32.xlu0 %v231_v2  ;;  %256 = vperm.xlu1 %452, %v254_v3   ;;  %v245_v4 = vld [vmem:[%s223_s12] sm:$0xff]  ;;  %vm281_vm3 = vcmp.lt.s32.totalorder %v280_v32, 20  ;;  %s471_s9 = sshra.s32 %s313_s5, 4  ;;  %s477_s12 = scalar_lea.hbm %s654_s4, 24  ;;  %s472_s9 = int_to_ptr.hbm [resolvable:$true] %s471_s9 }
  0x1c   : > { %s473_s10 = scalar_lea.hbm %s472_s9, 8  ;;  %p478_p0 = scmp.lt.s32.totalorder %s472_s9, %s654_s4 }
  0x1d   : > { %p474_p11 = scmp.ne.s32.totalorder %s472_s9, %s473_s10  ;;  %p479_p1 = scmp.lt.s32.totalorder %s477_s12, %s473_s10 }
  0x1f   : > { %p475_p12 = pnand %p474_p11, %p588_p5  ;;  %p480_p2 = por %p479_p1, %p478_p0 }
  0x21   : > { %p476_p13 = pneg %p475_p12 }
  0x23   : > { %p481_p3 = pnand %p480_p2, %p476_p13 }
  0x2f   : > { %247 = vperm.xlu0 %451, %v245_v4  }
  0x8d   : > { %v257_v13 = vpop.permute.xlu1 %256 }
  0x8e   : > { %v233_v5 = vpop.xlane.xlu0 %232  ;;  %vm258_vm2 = vcmp.eq.s32.totalorder %v244_v11, %v257_v13 }
  0x8f   : > { %v234_v6 = vsub.f32 %v228_v1, %v233_v5  ;;  %v259_v16 = vsel %vm258_vm2, %v228_v1, 0.0 }
  0x90   : > { %v260_v17 = vsel %vm230_vm0, %v259_v16, 0.0 }
  0x91   : > { %v235_v7 = vmul.f32 1.442695, %v234_v6 }
  0x93   : > { %453 = vpow2.f32 %v235_v7 }
  0x99   : > { %v454_v8 = vpop.eup %453 }
  0x9a   : > { %v237_v9 = vsel %vm230_vm0, %v454_v8, 0.0 }
  0x9b   : > { %238 = vadd.xlane.f32.xlu1 %v237_v9 }
  0xa1   : > { %v248_v12 = vpop.permute.xlu0 %247 }
  0xa2   : > { %vm249_vm1 = vcmp.eq.s32.totalorder %v244_v11, %v248_v12 }
  0xa3   : > { %v250_v14 = vsel %vm249_vm1, %v228_v1, 0.0 }
  0xa4   : > { %v251_v15 = vsel %vm230_vm0, %v250_v14, 0.0 }
  0xa5   : > { %252 = vadd.xlane.f32.xlu2 %v251_v15 }
  0xad   : > { %261 = vadd.xlane.f32.xlu2 %v260_v17 }
  0xb5   : > { %264 = vadd.xlane.f32.xlu2 %v263_v18 }
 0x10e   : > { %v239_v20 = vpop.xlane.xlu1 %238 }
 0x10f   : > { %455 = vlog2.f32 %v239_v20 }
 0x115   : > { %v456_v26 = vpop.eup %455 }
 0x116   : > { %v241_v30 = vmul.f32 0.6931472, %v456_v26 }
 0x118   : > { %v253_v19 = vpop.xlane.xlu2 %252  ;;  %v242_v35 = vadd.f32 %v241_v30, %v233_v5 }
 0x119   : > { %v268_v25 = vmul.f32 %v267_v22, %v253_v19 }
 0x120   : > { %v262_v23 = vpop.xlane.xlu2 %261 }
 0x121   : > { %v271_v24 = vmul.f32 %v270_v21, %v262_v23 }
 0x123   : > { %v272_v28 = vadd.f32 %v271_v24, %v268_v25 }
 0x125   : > { %v273_v33 = vmul.f32 0.9, %v272_v28 }
 0x128   : > { %v265_v31 = vpop.xlane.xlu2 %264 }
 0x129   : > { %v266_v34 = vmul.f32 0.003125, %v265_v31 }
 0x12b   : > { %v274_v36 = vadd.f32 %v273_v33, %v266_v34 }
 0x12d   : > { %v275_v37 = vsub.f32 %v242_v35, %v274_v36 }
 0x12f   : > { %v282_v38 = vsel %vm281_vm3, %v275_v37, 0.0 }
 0x130   : > { %v284_v39 = vsel %vm283_vm4, %v282_v38, 0.0 }
 0x131   : > { %285 = vadd.xlane.f32.xlu2 %v284_v39 }
 0x1a4   : > { %v286_v40 = vpop.xlane.xlu2 %285 }
 0x1a5   : > { %v287_v41 = vrot.slane %v286_v40, 4 }
 0x1a7   : > { %v288_v42 = vadd.f32 %v287_v41, %v286_v40 }
 0x1a9   : > { %v289_v43 = vrot.slane %v288_v42, 2 }
 0x1ab   : > { %v290_v44 = vadd.f32 %v289_v43, %v288_v42 }
 0x1ad   : > { %v291_v45 = vrot.slane %v290_v44, 1 }
 0x1af   : > { %v292_v46 = vadd.f32 %v291_v45, %v290_v44 }
 0x1b1   : > { %409 = vpush %v292_v46 }
 0x1e2   : > { %s410_s6 = spop %409 }
 0x1e3   : > { %s294_s7 = smul.f32 0.05, %s410_s6 }
 0x1e5   : > { %v295_v47 = vstv %s294_s7 }
 0x1e6   : > { %296 = vst [vmem:[%s215_s29] sm:$0xff] %v295_v47 }
 0x1e7   : > { %484 = shalt.err (!%p481_p3)
}
 0x1e8   : > { %411 = dma.vmem_to_hbm [thread:$0]  (%p588_p5), %s311_s30, 128, %s313_s5, %s298_s8  }
 0x1e9 PF: > { %p417_p4 = scmp.ge.s32.totalorder %s519_s20, 2  ;;  %s324_s15 = sand.u32 1, %s507_s17  }
 0x1ea   : > { %s325_s16 = scalar_lea.sflag [#allocation4], %s324_s15 }
 0x1eb   : > { %p414_p7 = pnand %p417_p4, %p592_p6 }
 0x1ed   : > { %p415_p8 = pneg %p414_p7 }
 0x1ef   : > { %502 = dma.done.wait (%p415_p8), %s325_s16, 128  }
 0x1f0   : > { %504 = vsyncadd (%p415_p8), %s325_s16, 4294967168  ;;  %p15_p9 = scmp.ge.s32.totalorder %s575_s22, 5   ;;  %s657_s17 = smov %s511_s18 }
 0x1f1   : > { %s658_s18 = smov %s515_s19  ;;  %s659_s19 = smov %s586_s25 }
 0x1f2   : > { %s660_s20 = smov %s575_s22  ;;  %17 = sbr.rel (!%p15_p9) target bundleno = 5 (0x5), region = 77 }
 0x1f7   :  { %331 = vsyncpa [#allocation4], 1 }
 0x1f8   :  { %333 = vsyncpa [#allocation4 + $0x1], 1 }

</bundles_post_ra>
